<compile_context>
chip_gen: v5e
topology: v5e:2x2
jax: 0.10.0
libtpu: 0.0.40
codegen_flags: <defaults>
</compile_context>

<pallas_src>
import math
import functools

import jax
import jax.numpy as jnp
from jax.experimental import pallas as pl
from jax.experimental.pallas import tpu as pltpu

_LANE = 128      # lane width (last dim of an f32 vreg)
_SUBLANE = 8     # sublanes of an f32 vreg


def _round_up(x, m):
    return (x + m - 1) // m * m


def _embedding_kernel(idx_ref, table_ref, out_ref):
    # idx_ref:   (T, 1)  int32 token ids for this grid step (VMEM block)
    # table_ref: (V, E)  full embedding table, VMEM resident (constant index_map)
    # out_ref:   (T, E)  lane-dense output tile
    idx = idx_ref[...]                                    # (T, 1) int32
    t = idx.shape[0]
    v = table_ref.shape[0]
    # one_hot[r, c] = (idx[r] == c); padding ids (-1) match nothing -> zero rows.
    iota_v = jax.lax.broadcasted_iota(jnp.int32, (t, v), 1)
    one_hot = (idx == iota_v).astype(table_ref.dtype)     # (T, V)
    out_ref[...] = jnp.dot(
        one_hot, table_ref[...], preferred_element_type=jnp.float32
    ).astype(out_ref.dtype)


def embedding_lookup(table, indices, *, tokens_per_block=128):
    """Pallas equivalent of `table[indices]` (PyTorch Embedding.forward)."""
    V, E = table.shape
    in_shape = indices.shape
    dt = table.dtype

    # Pad table: E -> multiple of 128 (lane-dense output), V -> multiple of 8.
    E_pad = _round_up(E, _LANE)
    V_pad = _round_up(V, _SUBLANE)
    if (V_pad, E_pad) != (V, E):
        table = jnp.pad(table, ((0, V_pad - V), (0, E_pad - E)))

    table_bytes = V_pad * E_pad * dt.itemsize
    out_tile_bytes = tokens_per_block * E_pad * dt.itemsize
    idx_tile_bytes = tokens_per_block * 4

    # VMEM-resident one-hot gather path is only valid for small/medium vocabs.
    # TODO(synk): add an HBM-resident (memory_space=pl.ANY) double-buffered DMA
    #             row-gather path for vocabularies that exceed scoped VMEM.
    assert table_bytes + 2 * out_tile_bytes <= 12 * 1024 * 1024, (
        "embedding table too large for the VMEM-resident one-hot gather path")

    # Flatten indices; pad token stream to a multiple of the block size with -1
    # (matches no row -> zero output rows, sliced off below).
    flat_idx = indices.reshape(-1).astype(jnp.int32)
    n_tok = flat_idx.shape[0]
    n_pad = _round_up(max(n_tok, 1), tokens_per_block)
    if n_pad != n_tok:
        flat_idx = jnp.pad(flat_idx, (0, n_pad - n_tok), constant_values=-1)
    idx_col = flat_idx.reshape(n_pad, 1)
    n_blocks = n_pad // tokens_per_block

    # Explicit scoped-VMEM budget: 2x (double-buffered) each operand + headroom,
    # clamped to a range that is safe on v5e/v6e/v7x.
    vmem_needed = 2 * (table_bytes + out_tile_bytes + idx_tile_bytes) + (4 << 20)
    vmem_limit = int(min(max(vmem_needed, 16 << 20), 32 << 20))

    out_flat = pl.pallas_call(
        _embedding_kernel,
        out_shape=jax.ShapeDtypeStruct((n_pad, E_pad), dt),
        grid=(n_blocks,),
        in_specs=[
            # Per-step block of token ids (VMEM, not SMEM scalar prefetch).
            pl.BlockSpec((tokens_per_block, 1), lambda i: (i, 0)),
            # Full table, constant block index -> fetched once, reused.
            pl.BlockSpec((V_pad, E_pad), lambda i: (0, 0)),
        ],
        out_specs=pl.BlockSpec((tokens_per_block, E_pad), lambda i: (i, 0)),
        compiler_params=pltpu.CompilerParams(
            dimension_semantics=("parallel",),   # independent tiles -> megacore
            vmem_limit_bytes=vmem_limit,
        ),
    )(idx_col, table)

    out = out_flat[:n_tok, :E]
    return out.reshape(*in_shape, E)


def init_embedding_params(key, vocab_size, embedding_size, dtype=jnp.float32):
    # Matches PyTorch init: uniform(-stdv, stdv), stdv = 1/sqrt(embedding_size)
    stdv = 1.0 / math.sqrt(embedding_size)
    return jax.random.uniform(key, (vocab_size, embedding_size),
                              dtype=dtype, minval=-stdv, maxval=stdv)


if __name__ == "__main__":
    vocab_size = 32
    embedding_size = 128
    batch, seq = 2, 8

    key = jax.random.PRNGKey(0)
    k_tab, k_idx = jax.random.split(key)

    table = init_embedding_params(k_tab, vocab_size, embedding_size)
    indices = jax.random.randint(k_idx, (batch, seq), 0, vocab_size,
                                 dtype=jnp.int32)

    out = embedding_lookup(table, indices)
    out = jax.block_until_ready(out)

    # Reference check against plain JAX gather.
    ref = jnp.take(table, indices, axis=0)
    assert out.shape == (batch, seq, embedding_size)
    assert jnp.allclose(out, ref), "mismatch vs reference gather"

    print("KERNEL_OK")
</pallas_src>

<mosaic_0001>
module attributes {stable_mosaic.version = 11 : i64} {
  func.func @_embedding_kernel(%arg0: i32, %arg1: memref<128x1xi32, #tpu.memory_space<vmem>>, %arg2: memref<32x128xf32, #tpu.memory_space<vmem>>, %arg3: memref<128x128xf32, #tpu.memory_space<vmem>>) attributes {dimension_semantics = [#tpu.dimension_semantics<parallel>], iteration_bounds = array<i64: 1>, scalar_prefetch = 0 : i64, scratch_operands = 0 : i64, tpu.core_type = #tpu.core_type<tc>, window_params = [{transform_indices = @transform_0, window_bounds = array<i64: 128, 1>}, {pipeline_mode = #tpu.pipeline_mode<synchronous>, transform_indices = @transform_1, window_bounds = array<i64: 32, 128>}, {transform_indices = @transform_2, window_bounds = array<i64: 128, 128>}]} {
    %c0 = arith.constant 0 : index
    %c0_0 = arith.constant 0 : index
    %0 = vector.load %arg1[%c0, %c0_0] : memref<128x1xi32, #tpu.memory_space<vmem>>, vector<128x1xi32>
    %1 = tpu.iota {dimensions = array<i32: 1>} : vector<128x32xi32>
    %2 = vector.broadcast %0 : vector<128x1xi32> to vector<128x32xi32>
    %3 = arith.cmpi eq, %2, %1 : vector<128x32xi32>
    %4 = arith.extui %3 : vector<128x32xi1> to vector<128x32xi32>
    %5 = arith.sitofp %4 : vector<128x32xi32> to vector<128x32xf32>
    %c0_1 = arith.constant 0 : index
    %c0_2 = arith.constant 0 : index
    %6 = vector.load %arg2[%c0_1, %c0_2] : memref<32x128xf32, #tpu.memory_space<vmem>>, vector<32x128xf32>
    %cst = arith.constant dense<0.000000e+00> : vector<128x128xf32>
    %7 = tpu.matmul %5, %6, %cst {dimension_numbers = #tpu.dot_dimension_numbers<[1], [0], [0], [1], [0, 0, 1, 1], [], []>} : vector<128x32xf32>, vector<32x128xf32>, vector<128x128xf32> -> vector<128x128xf32>
    %c0_3 = arith.constant 0 : index
    %c0_4 = arith.constant 0 : index
    %8 = vector.load %arg3[%c0_3, %c0_4] : memref<128x128xf32, #tpu.memory_space<vmem>>, vector<128x128xf32>
    tpu.vector_store %arg3[%c0_3, %c0_4], %7 {strides = array<i32>} : memref<128x128xf32, #tpu.memory_space<vmem>>, vector<128x128xf32>,
    return
  }
  func.func @transform_0(%arg0: i32) -> (i32, i32) {
    %c0_i32 = arith.constant 0 : i32
    %c0_i32_0 = arith.constant 0 : i32
    return %arg0, %c0_i32 : i32, i32
  }
  func.func @transform_1(%arg0: i32) -> (i32, i32) {
    %c0_i32 = arith.constant 0 : i32
    %c0_i32_0 = arith.constant 0 : i32
    %c0_i32_1 = arith.constant 0 : i32
    return %c0_i32, %c0_i32_0 : i32, i32
  }
  func.func @transform_2(%arg0: i32) -> (i32, i32) {
    %c0_i32 = arith.constant 0 : i32
    %c0_i32_0 = arith.constant 0 : i32
    return %arg0, %c0_i32 : i32, i32
  }
}

</mosaic_0001>

<bundles_post_ra>
// kernel: tpu_custom_call.1
= control target key start
LH: loop header
LB: loop body
LE: loop exit
PB: predicated region body
PF: predicated region fallthrough
CT: control target
= control target key end

     0   :  { %v356_v3 = vmov 0   ;;  %s473_s0 = inlined_call_operand.vmem [shape: s32[128,1], index: 0, kind: input, shape index: {}]   ;;  %s474_s1 = inlined_call_operand.vmem [shape: f32[32,128], index: 1, kind: input, shape index: {}]   ;;  %s475_s2 = inlined_call_operand.hbm [shape: f32[128,128], index: 2, kind: output, shape index: {}]  }
   0x1   :  { %v21_v0 = vld [vmem:[%s473_s0 + $0x48] sm:$0xff]  ;;  %v20_v1 = vld [vmem:[%s473_s0 + $0x40] sm:$0xff]  ;;  %329 = vset.pattern.permute.xlu2 %v356_v3  ;;  %328 = vset.pattern.permute.xlu1 %v356_v3 }
   0x2   :  { %v12_v2 = vld [vmem:[%s473_s0] sm:$0xff]  ;;  %327 = vset.pattern.permute.xlu0 %v356_v3  ;;  %58 = vperm.xlu2 %329, %v21_v0  }
   0x3   :  { %55 = vperm.xlu0 %327, %v20_v1   ;;  %31 = vperm.xlu1 %328, %v12_v2  }
   0x4   :  { %7 = vsyncpa [#allocation3], 0  ;;  %v25_v4 = vld [vmem:[%s473_s0 + $0x68] sm:$0xff]  ;;  %v24_v5 = vld [vmem:[%s473_s0 + $0x60] sm:$0xff]  ;;  %v28_v22 = vlaneseq  ;;  %vm130_vm0 = vcmask 261120   ;;  %v357_v27 = vmov 0.0  }
   0x5   :  { %v16_v6 = vld [vmem:[%s473_s0 + $0x20] sm:$0xff]  ;;  %v22_v7 = vld [vmem:[%s473_s0 + $0x50] sm:$0xff]  ;;  %v13_v8 = vld [vmem:[%s473_s0 + $0x8] sm:$0xff]  ;;  %s266_s23 = sshll.u32 %s475_s2, 4  ;;  %s359_s24 = smov 128   ;;  %s267_s23 = int_to_ptr.hbm [resolvable:$true] %s266_s23 }
   0x6   :  { %v17_v9 = vld [vmem:[%s473_s0 + $0x28] sm:$0xff]  ;;  %v18_v10 = vld [vmem:[%s473_s0 + $0x30] sm:$0xff]  ;;  %v15_v13 = vld [vmem:[%s473_s0 + $0x18] sm:$0xff]  ;;  %v436_v23 = vand.u32 127, %v28_v22  ;;  %s360_s25 = smov 8  }
   0x7   :  { %v26_v11 = vld [vmem:[%s473_s0 + $0x70] sm:$0xff]  ;;  %v23_v14 = vld [vmem:[%s473_s0 + $0x58] sm:$0xff]  ;;  %v127_v19 = vld [vmem:[%s474_s1 + $0x8] sm:$0xff] }
   0x8   :  { %v14_v12 = vld [vmem:[%s473_s0 + $0x10] sm:$0xff]  ;;  %v27_v15 = vld [vmem:[%s473_s0 + $0x78] sm:$0xff]  ;;  %v126_v20 = vld [vmem:[%s474_s1] sm:$0xff] }
   0x9   :  { %v19_v16 = vld [vmem:[%s473_s0 + $0x38] sm:$0xff]  ;;  %v128_v18 = vld [vmem:[%s474_s1 + $0x10] sm:$0xff] }
   0xa   :  { %70 = vperm.xlu2 %329, %v25_v4   ;;  %v129_v17 = vld [vmem:[%s474_s1 + $0x18] sm:$0xff]  ;;  %s358_s1 = smov [#allocation2]  }
   0xb   :  { %67 = vperm.xlu0 %327, %v24_v5   ;;  %43 = vperm.xlu1 %328, %v16_v6   ;;  %s264_s20 = sshll.u32 %s358_s1, 4  ;;  %s265_s20 = int_to_ptr.vmem [resolvable:$true] %s264_s20 }
   0xc   :  { %311 = vmatpush.msra.mxu2 %v129_v17  ;;  %191 = vmatpush.msra.mxu0 %v129_v17 }
   0xd   :  { %310 = vmatpush.msra.mxu1 %v129_v17  ;;  %312 = vmatpush.msra.mxu3 %v129_v17 }
   0xe   :  { %314 = vmatpush.msra.mxu2 %v128_v18  ;;  %192 = vmatpush.msra.mxu0 %v128_v18 }
   0xf   :  { %313 = vmatpush.msra.mxu1 %v128_v18  ;;  %315 = vmatpush.msra.mxu3 %v128_v18 }
  0x10   :  { %317 = vmatpush.msra.mxu2 %v127_v19  ;;  %193 = vmatpush.msra.mxu0 %v127_v19 }
  0x11   :  { %316 = vmatpush.msra.mxu1 %v127_v19  ;;  %318 = vmatpush.msra.mxu3 %v127_v19 }
  0x12   :  { %61 = vperm.xlu2 %329, %v22_v7   ;;  %320 = vmatpush.msra.mxu2 %v126_v20 }
  0x13   :  { %34 = vperm.xlu0 %327, %v13_v8   ;;  %46 = vperm.xlu1 %328, %v17_v9  }
  0x14   :  { %194 = vmatpush.msra.mxu0 %v126_v20  ;;  %319 = vmatpush.msra.mxu1 %v126_v20 }
  0x15   :  { %321 = vmatpush.msra.mxu3 %v126_v20 }
  0x1a   :  { %49 = vperm.xlu2 %329, %v18_v10  }
  0x1b   :  { %73 = vperm.xlu0 %327, %v26_v11   ;;  %37 = vperm.xlu1 %328, %v14_v12  }
  0x22   :  { %40 = vperm.xlu2 %329, %v15_v13  }
  0x23   :  { %64 = vperm.xlu0 %327, %v23_v14   ;;  %76 = vperm.xlu1 %328, %v27_v15  }
  0x2b   :  { %52 = vperm.xlu0 %327, %v19_v16  }
  0x5c   :  { %v59_v21 = vpop.permute.xlu2 %58 }
  0x5d   :  { %vm87_vm3 = vcmp.eq.s32.totalorder %v59_v21, %v436_v23 }
  0x5e   :  { %v287_v31 = vsel %vm87_vm3, 1.0, %v357_v27 }
  0x64   :  { %v71_v24 = vpop.permute.xlu2 %70 }
  0x65   :  { %vm91_vm6 = vcmp.eq.s32.totalorder %v71_v24, %v436_v23 }
  0x66   :  { %v291_v41 = vsel %vm91_vm6, 1.0, %v357_v27 }
  0x6c   :  { %v62_v30 = vpop.permute.xlu2 %61 }
  0x6d   :  { %vm88_vm7 = vcmp.eq.s32.totalorder %v62_v30, %v436_v23 }
  0x6e   :  { %v288_v42 = vsel %vm88_vm7, 1.0, %v357_v27 }
  0x74   :  { %v50_v38 = vpop.permute.xlu2 %49 }
  0x75   :  { %v56_v25 = vpop.permute.xlu0 %55  ;;  %v32_v26 = vpop.permute.xlu1 %31  ;;  %vm84_vm10 = vcmp.eq.s32.totalorder %v50_v38, %v436_v23 }
  0x76   :  { %vm86_vm1 = vcmp.eq.s32.totalorder %v56_v25, %v436_v23  ;;  %vm78_vm2 = vcmp.eq.s32.totalorder %v32_v26, %v436_v23  ;;  %v284_v45 = vsel %vm84_vm10, 1.0, %v357_v27 }
  0x77   :  { %v286_v28 = vsel %vm86_vm1, 1.0, %v357_v27  ;;  %v278_v29 = vsel %vm78_vm2, 1.0, %v357_v27 }
  0x78   :  { %302 = vmatmul.msk.f32.vlgmr.msra.gmra.mxu2 %vm130_vm0, %v286_v28  ;;  %294 = vmatmul.msk.f32.vlgmr.msra.gmra.mxu0 %vm130_vm0, %v278_v29 }
  0x7c   :  { %v41_v48 = vpop.permute.xlu2 %40 }
  0x7d   :  { %v68_v32 = vpop.permute.xlu0 %67  ;;  %v44_v33 = vpop.permute.xlu1 %43  ;;  %vm81_vm13 = vcmp.eq.s32.totalorder %v41_v48, %v436_v23 }
  0x7e   :  { %vm90_vm4 = vcmp.eq.s32.totalorder %v68_v32, %v436_v23  ;;  %vm82_vm5 = vcmp.eq.s32.totalorder %v44_v33, %v436_v23  ;;  %v281_v51 = vsel %vm81_vm13, 1.0, %v357_v27 }
  0x7f   :  { %v290_v34 = vsel %vm90_vm4, 1.0, %v357_v27  ;;  %v282_v35 = vsel %vm82_vm5, 1.0, %v357_v27 }
  0x80   :  { %298 = vmatmul.msk.f32.vlgmr.msra.gmra.mxu1 %vm130_vm0, %v282_v35  ;;  %303 = vmatmul.msk.f32.gmra.mxu2 %vm130_vm0, %v287_v31 }
  0x81   :  { %306 = vmatmul.msk.f32.vlgmr.msra.gmra.mxu3 %vm130_vm0, %v290_v34 }
  0x85   :  { %v35_v36 = vpop.permute.xlu0 %34  ;;  %v47_v37 = vpop.permute.xlu1 %46 }
  0x86   :  { %vm79_vm8 = vcmp.eq.s32.totalorder %v35_v36, %v436_v23  ;;  %vm83_vm9 = vcmp.eq.s32.totalorder %v47_v37, %v436_v23 }
  0x87   :  { %v279_v39 = vsel %vm79_vm8, 1.0, %v357_v27  ;;  %v283_v40 = vsel %vm83_vm9, 1.0, %v357_v27 }
  0x88   :  { %295 = vmatmul.msk.f32.gmra.mxu0 %vm130_vm0, %v279_v39  ;;  %299 = vmatmul.msk.f32.gmra.mxu1 %vm130_vm0, %v283_v40 }
  0x89   :  { %304 = vmatmul.msk.f32.gmra.mxu2 %vm130_vm0, %v288_v42  ;;  %307 = vmatmul.msk.f32.gmra.mxu3 %vm130_vm0, %v291_v41 }
  0x8d   :  { %v74_v43 = vpop.permute.xlu0 %73  ;;  %v38_v44 = vpop.permute.xlu1 %37 }
  0x8e   :  { %vm92_vm11 = vcmp.eq.s32.totalorder %v74_v43, %v436_v23  ;;  %vm80_vm12 = vcmp.eq.s32.totalorder %v38_v44, %v436_v23 }
  0x8f   :  { %v292_v46 = vsel %vm92_vm11, 1.0, %v357_v27  ;;  %v280_v47 = vsel %vm80_vm12, 1.0, %v357_v27 }
  0x90   :  { %296 = vmatmul.msk.f32.gmra.mxu0 %vm130_vm0, %v280_v47  ;;  %300 = vmatmul.msk.f32.gmra.mxu1 %vm130_vm0, %v284_v45 }
  0x91   :  { %308 = vmatmul.msk.f32.gmra.mxu3 %vm130_vm0, %v292_v46 }
  0x95   :  { %v65_v49 = vpop.permute.xlu0 %64  ;;  %v77_v50 = vpop.permute.xlu1 %76 }
  0x96   :  { %vm89_vm14 = vcmp.eq.s32.totalorder %v65_v49, %v436_v23  ;;  %vm93_vm15 = vcmp.eq.s32.totalorder %v77_v50, %v436_v23 }
  0x97   :  { %v289_v52 = vsel %vm89_vm14, 1.0, %v357_v27  ;;  %v293_v53 = vsel %vm93_vm15, 1.0, %v357_v27 }
  0x98   :  { %297 = vmatmul.msk.f32.gmra.mxu0 %vm130_vm0, %v281_v51  ;;  %305 = vmatmul.msk.f32.gmra.mxu2 %vm130_vm0, %v289_v52 }
  0x99   :  { %309 = vmatmul.msk.f32.gmra.mxu3 %vm130_vm0, %v293_v53 }
  0x9d   :  { %v53_v54 = vpop.permute.xlu0 %52 }
  0x9e   :  { %vm85_vm1 = vcmp.eq.s32.totalorder %v53_v54, %v436_v23 }
  0x9f   :  { %v285_v55 = vsel %vm85_vm1, 1.0, %v357_v27 }
  0xa0   :  { %301 = vmatmul.msk.f32.gmra.mxu1 %vm130_vm0, %v285_v55 }
  0xf5   :  { %v196_v56 = vpop.f32.mrf.mxu0 }
  0xf6   :  { %244 = vst [vmem:[#allocation2] sm:$0xff] %v196_v56 }
  0xfb   :  { %v220_v57 = vpop.f32.mrf.mxu2 }
  0xfc   :  { %252 = vst [vmem:[#allocation2 + $0x40] sm:$0xff] %v220_v57 }
  0xfd   :  { %v208_v58 = vpop.f32.mrf.mxu1 }
  0xfe   :  { %248 = vst [vmem:[#allocation2 + $0x20] sm:$0xff] %v208_v58 }
 0x103   :  { %v223_v59 = vpop.f32.mrf.mxu2 }
 0x104   :  { %253 = vst [vmem:[#allocation2 + $0x48] sm:$0xff] %v223_v59  ;;  %v232_v60 = vpop.f32.mrf.mxu3 }
 0x105   :  { %256 = vst [vmem:[#allocation2 + $0x60] sm:$0xff] %v232_v60  ;;  %v199_v61 = vpop.f32.mrf.mxu0  ;;  %v211_v62 = vpop.f32.mrf.mxu1 }
 0x106   :  { %245 = vst [vmem:[#allocation2 + $0x8] sm:$0xff] %v199_v61 }
 0x107   :  { %249 = vst [vmem:[#allocation2 + $0x28] sm:$0xff] %v211_v62 }
 0x10c   :  { %v226_v63 = vpop.f32.mrf.mxu2  ;;  %v235_v0 = vpop.f32.mrf.mxu3 }
 0x10d   :  { %254 = vst [vmem:[#allocation2 + $0x50] sm:$0xff] %v226_v63  ;;  %v202_v1 = vpop.f32.mrf.mxu0  ;;  %v214_v2 = vpop.f32.mrf.mxu1 }
 0x10e   :  { %257 = vst [vmem:[#allocation2 + $0x68] sm:$0xff] %v235_v0 }
 0x10f   :  { %246 = vst [vmem:[#allocation2 + $0x10] sm:$0xff] %v202_v1 }
 0x110   :  { %250 = vst [vmem:[#allocation2 + $0x30] sm:$0xff] %v214_v2 }
 0x114   :  { %v238_v3 = vpop.f32.mrf.mxu3 }
 0x115   :  { %258 = vst [vmem:[#allocation2 + $0x70] sm:$0xff] %v238_v3  ;;  %v205_v4 = vpop.f32.mrf.mxu0 }
 0x116   :  { %247 = vst [vmem:[#allocation2 + $0x18] sm:$0xff] %v205_v4 }
 0x11b   :  { %v229_v5 = vpop.f32.mrf.mxu2 }
 0x11c   :  { %255 = vst [vmem:[#allocation2 + $0x58] sm:$0xff] %v229_v5  ;;  %v241_v6 = vpop.f32.mrf.mxu3 }
 0x11d   :  { %259 = vst [vmem:[#allocation2 + $0x78] sm:$0xff] %v241_v6  ;;  %v217_v7 = vpop.f32.mrf.mxu1 }
 0x11e   :  { %251 = vst [vmem:[#allocation2 + $0x38] sm:$0xff] %v217_v7 }
 0x11f   :  { %272 = dma.vmem_to_hbm [thread:$0]  %s265_s20, 2048, %s267_s23, [#allocation3], %s359_s24, %s359_s24, %s360_s25  }
 0x120   :  { %354 = dma.done.wait [#allocation3], 2048  }
 0x121   :  { %355 = vsyncadd [#allocation3], 4294965248 }
 0x122   :  { %277 = vsyncpa [#allocation3], 1 }

</bundles_post_ra>
